<compile_context>
chip_gen: v7x
topology: tpu7x:2x2x1
jax: 0.10.0
libtpu: 0.0.40
codegen_flags: <defaults>
</compile_context>

<pallas_src>
import functools

import jax
import jax.numpy as jnp
from jax.experimental import pallas as pl
from jax.experimental.pallas import tpu as pltpu


def _residual_block_kernel(seed_ref, x_ref, w_ref, b_ref, o_ref, xnorm_ref, *,
                           dropout_p, alpha, beta, eps, tm, tn, use_hw_prng):
    i = pl.program_id(0)          # row-tile index
    j = pl.program_id(1)          # weight column-tile index
    d = x_ref.shape[-1]           # static hidden size

    # ---- LayerNorm once per row tile; stash bf16 x_norm for reuse across j ----
    # torch: alpha * (x - mean) / (std_unbiased + eps) + beta
    @pl.when(j == 0)
    def _():
        x = x_ref[...].astype(jnp.float32)                       # (TM, D)
        # Fused reductions: sum(x) and sum(x*x) have no serial dependency and
        # avoid materializing a (TM, D) `centered` temp before the reduction.
        s1 = jnp.sum(x, axis=-1, keepdims=True)                  # (TM, 1)
        s2 = jnp.sum(x * x, axis=-1, keepdims=True)              # (TM, 1)
        mean = s1 * (1.0 / d)
        # sum((x-mean)^2) == s2 - s1*mean; guard tiny negative from cancellation.
        var = jnp.maximum(s2 - s1 * mean, 0.0) * (1.0 / (d - 1))  # unbiased
        scale = alpha / (jnp.sqrt(var) + eps)                     # (TM, 1)
        xnorm_ref[...] = ((x - mean) * scale + beta).astype(xnorm_ref.dtype)

    # ---- sublayer: Linear(D, D) column block on the MXU (bf16 in, f32 acc) ----
    y = jnp.dot(xnorm_ref[...], w_ref[...],
                preferred_element_type=jnp.float32)               # (TM, TN)
    y = y + b_ref[...].astype(jnp.float32)                        # (1, TN) bcast

    # ---- dropout (inverted dropout, train-mode semantics) ----
    if dropout_p > 0.0:
        if use_hw_prng:
            # Hardware PRNG: one op for the whole (TM, TN) tile; seed varies
            # with the (row-tile, col-tile) coordinates so tiles never share a
            # mask.  Caller must vary `seed` per training step.
            pltpu.prng_seed(seed_ref[0], i, j)
            bits = pltpu.prng_random_bits((tm, tn))
            if bits.dtype != jnp.uint32:
                bits = pltpu.bitcast(bits, jnp.uint32)
        else:
            # Non-TPU / interpret fallback: counter-based murmur-style hash of
            # (seed, global row, global col) — overflow-safe mixing.
            r = (jax.lax.broadcasted_iota(jnp.int32, (tm, tn), 0)
                 + i * tm).astype(jnp.uint32)
            c = (jax.lax.broadcasted_iota(jnp.int32, (tm, tn), 1)
                 + j * tn).astype(jnp.uint32)
            h = r * jnp.uint32(0x9E3779B1) + c
            h = h + seed_ref[0].astype(jnp.uint32) * jnp.uint32(0x85EBCA77)
            h = h ^ (h >> 16)
            h = h * jnp.uint32(0x85EBCA6B)
            h = h ^ (h >> 13)
            h = h * jnp.uint32(0xC2B2AE35)
            h = h ^ (h >> 16)
            bits = h
        thr = jnp.uint32(min(int(round(dropout_p * 4294967296.0)), 4294967295))
        keep = bits >= thr                                        # P(keep)=1-p
        y = jnp.where(keep, y * (1.0 / (1.0 - dropout_p)), 0.0)

    # ---- residual add against the matching columns of x ----
    col0 = pl.multiple_of(j * tn, tn)
    x_cols = x_ref[:, pl.ds(col0, tn)].astype(jnp.float32)
    o_ref[...] = (x_cols + y).astype(o_ref.dtype)


def _round_up(x, m):
    return ((x + m - 1) // m) * m


def _vmem_capacity_bytes():
    try:
        return int(pltpu.get_tpu_info().vmem_capacity_bytes)
    except Exception:
        return 64 << 20          # conservative: v7x per-TensorCore VMEM


def _pick_tiles(n, d, usable_vmem):
    """Pick (row_tile, col_tile, vmem_estimate) that fit `usable_vmem`."""
    # Column tile of W: bound the (double-buffered) bf16 weight block; require
    # an exact divisor of D (multiple of 128) so the in-kernel residual column
    # slice never reads out of bounds.
    w_budget = min(24 << 20, usable_vmem // 3)
    if 2 * d * d <= w_budget:
        tn = d                                   # whole weight stays resident
    else:
        tn = d                                   # fallback if no clean divisor
        cap = max(128, (w_budget // (4 * d)) // 128 * 128)
        t = cap
        while t >= 128:
            if d % t == 0:
                tn = t
                break
            t -= 128

    # Row tile: big enough to amortize per-step overhead (~0.35us), small
    # enough that double-buffered x/out + weight + scratch + f32 temps fit.
    tm = min(512, max(16, _round_up(n, 16)))

    def footprint(tm_):
        wbuf = (1 if tn == d else 2) * d * tn * 2      # bf16 weight buffer(s)
        return (2 * tm_ * d * 4                        # x double buffer (f32)
                + 2 * tm_ * tn * 4                     # out double buffer (f32)
                + wbuf
                + tm_ * d * 2                          # x_norm scratch (bf16)
                + 4 * tm_ * max(d, tn) * 4             # f32 intermediates
                + (2 << 20))                           # slack

    while tm > 16 and footprint(tm) > usable_vmem:
        tm = max(16, _round_up(tm // 2, 16))
    return tm, tn, footprint(tm)


def residual_connection_block(x, w, b, seed, *, dropout_p=0.1,
                              alpha=1.0, beta=0.0, eps=1e-6):
    """x: (B, S, D); w: (D, D) (ideally pre-cast bf16); b: (1, D) or (D,);
    seed: (1,) int32 — vary per training step for fresh dropout masks."""
    assert 0.0 <= float(dropout_p) < 1.0, "dropout_p must be in [0, 1)"
    B, S, D = x.shape
    N = B * S
    x2 = x.reshape(N, D)
    # Pass bf16 weights from the caller to avoid a per-call HBM cast
    # (4*D^2 read + 2*D^2 write every invocation).
    w_bf16 = w if w.dtype == jnp.bfloat16 else w.astype(jnp.bfloat16)
    b2 = jnp.reshape(b, (1, D)).astype(jnp.float32)

    capacity = _vmem_capacity_bytes()
    usable = max(16 << 20, capacity - (12 << 20))     # leave Mosaic headroom
    TM, TN, est_vmem = _pick_tiles(N, D, usable)
    ni = pl.cdiv(N, TM)          # ragged last row tile is masked by Pallas
    nj = D // TN
    vmem_limit = int(min(max(est_vmem, 16 << 20), usable))

    on_tpu = jax.devices()[0].platform == "tpu"

    # TODO(synk): alpha/beta are baked in as compile-time scalars matching the
    # module's init (ones/zeros); pass them as SMEM scalars if they are trained.
    kernel = functools.partial(
        _residual_block_kernel,
        dropout_p=float(dropout_p), alpha=float(alpha), beta=float(beta),
        eps=float(eps), tm=TM, tn=TN, use_hw_prng=on_tpu)

    def build(single_buffer_resident):
        resident_kw = {}
        if single_buffer_resident and nj == 1:
            # Weight/bias blocks never change -> drop their second pipeline
            # buffer (halves resident-weight VMEM).
            resident_kw = dict(pipeline_mode=pl.Buffered(1))
        w_spec = pl.BlockSpec((D, TN), lambda i, j, s: (0, j), **resident_kw)
        b_spec = pl.BlockSpec((1, TN), lambda i, j, s: (0, j), **resident_kw)
        return pl.pallas_call(
            kernel,
            out_shape=jax.ShapeDtypeStruct((N, D), x.dtype),
            grid_spec=pltpu.PrefetchScalarGridSpec(
                num_scalar_prefetch=1,                 # seed -> SMEM
                grid=(ni, nj),
                in_specs=[
                    pl.BlockSpec((TM, D), lambda i, j, s: (i, 0)),  # x row tile
                    w_spec,                                          # W cols
                    b_spec,                                          # bias cols
                ],
                out_specs=pl.BlockSpec((TM, TN), lambda i, j, s: (i, j)),
                scratch_shapes=[pltpu.VMEM((TM, D), jnp.bfloat16)],  # x_norm
            ),
            compiler_params=pltpu.CompilerParams(
                dimension_semantics=("parallel", "arbitrary"),
                vmem_limit_bytes=vmem_limit),
        )

    try:
        out = build(True)(seed, x2, w_bf16, b2)
    except Exception:
        # Fallback for JAX versions that reject single-buffered BlockSpecs.
        out = build(False)(seed, x2, w_bf16, b2)
    return out.reshape(B, S, D)


def _reference_no_dropout(x, w, b, alpha, beta, eps):
    mean = x.mean(axis=-1, keepdims=True)
    var = jnp.sum((x - mean) ** 2, axis=-1, keepdims=True) / (x.shape[-1] - 1)
    xn = alpha * (x - mean) / (jnp.sqrt(var) + eps) + beta
    return x + xn @ w.astype(jnp.float32) + jnp.reshape(b, (1, -1))


if __name__ == "__main__":
    # Small, lane-friendly shapes: batch=2, seq=8, hidden=128.
    B, S, D = 2, 8, 128
    key = jax.random.PRNGKey(0)
    kx, kw, kb = jax.random.split(key, 3)

    x = jax.random.normal(kx, (B, S, D), dtype=jnp.float32)

    # Sublayer = Linear(D, D); weight pre-cast to bf16 ONCE (hoisted out of the
    # kernel call, per perf feedback).
    w = (jax.random.normal(kw, (D, D), dtype=jnp.float32)
         * (1.0 / D ** 0.5)).astype(jnp.bfloat16)
    b = jax.random.normal(kb, (1, D), dtype=jnp.float32) * 0.01

    # LayerNormalization params per __init__: alpha = ones(1), beta = zeros(1).
    alpha, beta, eps = 1.0, 0.0, 1e-6
    seed = jnp.array([0], dtype=jnp.int32)

    # Train-mode run with dropout.
    out = residual_connection_block(x, w, b, seed, dropout_p=0.1,
                                    alpha=alpha, beta=beta, eps=eps)
    out = jax.block_until_ready(out)
    assert out.shape == (B, S, D) and out.dtype == jnp.float32
    assert bool(jnp.all(jnp.isfinite(out)))

    # Numerical sanity check against a pure-JAX reference with dropout off
    # (loose tolerance: kernel uses bf16 MXU operands with f32 accumulation).
    out_nd = residual_connection_block(x, w, b, seed, dropout_p=0.0,
                                       alpha=alpha, beta=beta, eps=eps)
    out_nd = jax.block_until_ready(out_nd)
    ref = _reference_no_dropout(x, w, b, alpha, beta, eps)
    max_err = float(jnp.max(jnp.abs(out_nd - ref)))
    assert max_err < 0.1, f"max abs error {max_err}"

    print("KERNEL_OK")
</pallas_src>

<mosaic_0001>
module attributes {stable_mosaic.version = 11 : i64} {
  func.func @_residual_block_kernel(%arg0: i32, %arg1: i32, %arg2: memref<1xi32, #tpu.memory_space<smem>>, %arg3: memref<16x128xf32, #tpu.memory_space<vmem>>, %arg4: memref<128x128xbf16, #tpu.memory_space<vmem>>, %arg5: memref<1x128xf32, #tpu.memory_space<vmem>>, %arg6: memref<16x128xf32, #tpu.memory_space<vmem>>, %arg7: memref<16x128xbf16, #tpu.memory_space<vmem>>) attributes {dimension_semantics = [#tpu.dimension_semantics<parallel>, #tpu.dimension_semantics<arbitrary>], iteration_bounds = array<i64: 1, 1>, scalar_prefetch = 1 : i64, scratch_operands = 1 : i64, tpu.core_type = #tpu.core_type<tc>, window_params = [{transform_indices = @transform_0, window_bounds = array<i64: 16, 128>}, {pipeline_mode = #tpu.pipeline_mode<synchronous>, transform_indices = @transform_1, window_bounds = array<i64: 128, 128>}, {pipeline_mode = #tpu.pipeline_mode<synchronous>, transform_indices = @transform_2, window_bounds = array<i64: 1, 128>}, {transform_indices = @transform_3, window_bounds = array<i64: 16, 128>}]} {
    %c0_i32 = arith.constant 0 : i32
    %0 = arith.cmpi eq, %arg1, %c0_i32 : i32
    %1 = arith.extui %0 : i1 to i32
    %c0_i32_0 = arith.constant 0 : i32
    %2 = arith.cmpi ne, %1, %c0_i32_0 : i32
    scf.if %2 {
      %c0_15 = arith.constant 0 : index
      %c0_16 = arith.constant 0 : index
      %49 = vector.load %arg3[%c0_15, %c0_16] : memref<16x128xf32, #tpu.memory_space<vmem>>, vector<16x128xf32>
      %cst_17 = arith.constant dense<0.000000e+00> : vector<16xf32>
      %50 = vector.multi_reduction <add>, %49, %cst_17 [1] : vector<16x128xf32> to vector<16xf32>
      %51 = vector.shape_cast %50 : vector<16xf32> to vector<16x1xf32>
      %52 = arith.mulf %49, %49 : vector<16x128xf32>
      %cst_18 = arith.constant dense<0.000000e+00> : vector<16xf32>
      %53 = vector.multi_reduction <add>, %52, %cst_18 [1] : vector<16x128xf32> to vector<16xf32>
      %54 = vector.shape_cast %53 : vector<16xf32> to vector<16x1xf32>
      %cst_19 = arith.constant 7.812500e-03 : f32
      %55 = vector.broadcast %cst_19 : f32 to vector<16x1xf32>
      %56 = arith.mulf %51, %55 : vector<16x1xf32>
      %57 = arith.mulf %51, %56 : vector<16x1xf32>
      %58 = arith.subf %54, %57 : vector<16x1xf32>
      %cst_20 = arith.constant 0.000000e+00 : f32
      %59 = vector.broadcast %cst_20 : f32 to vector<16x1xf32>
      %60 = arith.maximumf %58, %59 : vector<16x1xf32>
      %cst_21 = arith.constant 0.00787401571 : f32
      %61 = vector.broadcast %cst_21 : f32 to vector<16x1xf32>
      %62 = arith.mulf %60, %61 : vector<16x1xf32>
      %63 = math.sqrt %62 : vector<16x1xf32>
      %cst_22 = arith.constant 9.99999997E-7 : f32
      %64 = vector.broadcast %cst_22 : f32 to vector<16x1xf32>
      %65 = arith.addf %63, %64 : vector<16x1xf32>
      %cst_23 = arith.constant 1.000000e+00 : f32
      %66 = vector.broadcast %cst_23 : f32 to vector<16x1xf32>
      %67 = arith.divf %66, %65 : vector<16x1xf32>
      %68 = vector.broadcast %56 : vector<16x1xf32> to vector<16x128xf32>
      %69 = arith.subf %49, %68 : vector<16x128xf32>
      %70 = vector.broadcast %67 : vector<16x1xf32> to vector<16x128xf32>
      %71 = arith.mulf %69, %70 : vector<16x128xf32>
      %cst_24 = arith.constant 0.000000e+00 : f32
      %72 = vector.broadcast %cst_24 : f32 to vector<16x128xf32>
      %73 = arith.addf %71, %72 : vector<16x128xf32>
      %74 = arith.truncf %73 : vector<16x128xf32> to vector<16x128xbf16>
      %c0_25 = arith.constant 0 : index
      %c0_26 = arith.constant 0 : index
      %75 = vector.load %arg7[%c0_25, %c0_26] : memref<16x128xbf16, #tpu.memory_space<vmem>>, vector<16x128xbf16>
      tpu.vector_store %arg7[%c0_25, %c0_26], %74 {strides = array<i32>} : memref<16x128xbf16, #tpu.memory_space<vmem>>, vector<16x128xbf16>,
    } else {
    }
    %c0 = arith.constant 0 : index
    %c0_1 = arith.constant 0 : index
    %3 = vector.load %arg7[%c0, %c0_1] : memref<16x128xbf16, #tpu.memory_space<vmem>>, vector<16x128xbf16>
    %c0_2 = arith.constant 0 : index
    %c0_3 = arith.constant 0 : index
    %4 = vector.load %arg4[%c0_2, %c0_3] : memref<128x128xbf16, #tpu.memory_space<vmem>>, vector<128x128xbf16>
    %cst = arith.constant dense<0.000000e+00> : vector<16x128xf32>
    %5 = tpu.matmul %3, %4, %cst {dimension_numbers = #tpu.dot_dimension_numbers<[1], [0], [0], [1], [0, 0, 1, 1], [], []>} : vector<16x128xbf16>, vector<128x128xbf16>, vector<16x128xf32> -> vector<16x128xf32>
    %c0_4 = arith.constant 0 : index
    %c0_5 = arith.constant 0 : index
    %6 = vector.load %arg5[%c0_4, %c0_5] : memref<1x128xf32, #tpu.memory_space<vmem>>, vector<1x128xf32>
    %7 = vector.broadcast %6 : vector<1x128xf32> to vector<16x128xf32>
    %8 = arith.addf %5, %7 : vector<16x128xf32>
    %9 = tpu.iota {dimensions = array<i32: 0>} : vector<16x128xi32>
    %c16_i32 = arith.constant 16 : i32
    %10 = arith.muli %arg0, %c16_i32 : i32
    %11 = vector.broadcast %10 : i32 to vector<16x128xi32>
    %12 = arith.addi %9, %11 : vector<16x128xi32>
    %13 = tpu.iota {dimensions = array<i32: 1>} : vector<16x128xi32>
    %c128_i32 = arith.constant 128 : i32
    %14 = arith.muli %arg1, %c128_i32 : i32
    %15 = vector.broadcast %14 : i32 to vector<16x128xi32>
    %16 = arith.addi %13, %15 : vector<16x128xi32>
    %c-1640531535_i32 = arith.constant -1640531535 : i32
    %17 = vector.broadcast %c-1640531535_i32 : i32 to vector<16x128xi32>
    %18 = arith.muli %12, %17 : vector<16x128xi32>
    %19 = arith.addi %18, %16 : vector<16x128xi32>
    %c0_6 = arith.constant 0 : index
    %20 = memref.load %arg2[%c0_6] : memref<1xi32, #tpu.memory_space<smem>>
    %c-2048144777_i32 = arith.constant -2048144777 : i32
    %21 = arith.muli %20, %c-2048144777_i32 : i32
    %22 = vector.broadcast %21 : i32 to vector<16x128xi32>
    %23 = arith.addi %19, %22 : vector<16x128xi32>
    %c16_i32_7 = arith.constant 16 : i32
    %24 = vector.broadcast %c16_i32_7 : i32 to vector<16x128xi32>
    %25 = arith.shrui %23, %24 : vector<16x128xi32>
    %26 = arith.xori %23, %25 : vector<16x128xi32>
    %c-2048144789_i32 = arith.constant -2048144789 : i32
    %27 = vector.broadcast %c-2048144789_i32 : i32 to vector<16x128xi32>
    %28 = arith.muli %26, %27 : vector<16x128xi32>
    %c13_i32 = arith.constant 13 : i32
    %29 = vector.broadcast %c13_i32 : i32 to vector<16x128xi32>
    %30 = arith.shrui %28, %29 : vector<16x128xi32>
    %31 = arith.xori %28, %30 : vector<16x128xi32>
    %c-1028477387_i32 = arith.constant -1028477387 : i32
    %32 = vector.broadcast %c-1028477387_i32 : i32 to vector<16x128xi32>
    %33 = arith.muli %31, %32 : vector<16x128xi32>
    %c16_i32_8 = arith.constant 16 : i32
    %34 = vector.broadcast %c16_i32_8 : i32 to vector<16x128xi32>
    %35 = arith.shrui %33, %34 : vector<16x128xi32>
    %36 = arith.xori %33, %35 : vector<16x128xi32>
    %c429496730_i32 = arith.constant 429496730 : i32
    %37 = vector.broadcast %c429496730_i32 : i32 to vector<16x128xi32>
    %38 = arith.cmpi uge, %36, %37 : vector<16x128xi32>
    %cst_9 = arith.constant 1.11111116 : f32
    %39 = vector.broadcast %cst_9 : f32 to vector<16x128xf32>
    %40 = arith.mulf %8, %39 : vector<16x128xf32>
    %cst_10 = arith.constant 0.000000e+00 : f32
    %41 = vector.broadcast %cst_10 : f32 to vector<16x128xf32>
    %42 = arith.select %38, %40, %41 : vector<16x128xi1>, vector<16x128xf32>
    %c128_i32_11 = arith.constant 128 : i32
    %43 = arith.muli %arg1, %c128_i32_11 : i32
    %44 = tpu.assume_multiple %43, 128 : i32
    %c0_12 = arith.constant 0 : index
    %45 = arith.index_cast %44 : i32 to index
    %46 = vector.load %arg3[%c0_12, %45] : memref<16x128xf32, #tpu.memory_space<vmem>>, vector<16x128xf32>
    %47 = arith.addf %46, %42 : vector<16x128xf32>
    %c0_13 = arith.constant 0 : index
    %c0_14 = arith.constant 0 : index
    %48 = vector.load %arg6[%c0_13, %c0_14] : memref<16x128xf32, #tpu.memory_space<vmem>>, vector<16x128xf32>
    tpu.vector_store %arg6[%c0_13, %c0_14], %47 {strides = array<i32>} : memref<16x128xf32, #tpu.memory_space<vmem>>, vector<16x128xf32>,
    return
  }
  func.func @transform_0(%arg0: i32, %arg1: i32, %arg2: memref<1xi32, #tpu.memory_space<smem>>) -> (i32, i32) {
    %c0_i32 = arith.constant 0 : i32
    %c0_i32_0 = arith.constant 0 : i32
    return %arg0, %c0_i32 : i32, i32
  }
  func.func @transform_1(%arg0: i32, %arg1: i32, %arg2: memref<1xi32, #tpu.memory_space<smem>>) -> (i32, i32) {
    %c0_i32 = arith.constant 0 : i32
    %c0_i32_0 = arith.constant 0 : i32
    return %c0_i32, %arg1 : i32, i32
  }
  func.func @transform_2(%arg0: i32, %arg1: i32, %arg2: memref<1xi32, #tpu.memory_space<smem>>) -> (i32, i32) {
    %c0_i32 = arith.constant 0 : i32
    %c0_i32_0 = arith.constant 0 : i32
    return %c0_i32, %arg1 : i32, i32
  }
  func.func @transform_3(%arg0: i32, %arg1: i32, %arg2: memref<1xi32, #tpu.memory_space<smem>>) -> (i32, i32) {
    %c0_i32 = arith.constant 0 : i32
    return %arg0, %arg1 : i32, i32
  }
}

module attributes {stable_mosaic.version = 11 : i64} {
  func.func @_residual_block_kernel(%arg0: i32, %arg1: i32, %arg2: memref<1xi32, #tpu.memory_space<smem>>, %arg3: memref<16x128xf32, #tpu.memory_space<vmem>>, %arg4: memref<128x128xbf16, #tpu.memory_space<vmem>>, %arg5: memref<1x128xf32, #tpu.memory_space<vmem>>, %arg6: memref<16x128xf32, #tpu.memory_space<vmem>>, %arg7: memref<16x128xbf16, #tpu.memory_space<vmem>>) attributes {dimension_semantics = [#tpu.dimension_semantics<parallel>, #tpu.dimension_semantics<arbitrary>], iteration_bounds = array<i64: 1, 1>, scalar_prefetch = 1 : i64, scratch_operands = 1 : i64, tpu.core_type = #tpu.core_type<tc>, window_params = [{transform_indices = @transform_0, window_bounds = array<i64: 16, 128>}, {transform_indices = @transform_1, window_bounds = array<i64: 128, 128>}, {transform_indices = @transform_2, window_bounds = array<i64: 1, 128>}, {transform_indices = @transform_3, window_bounds = array<i64: 16, 128>}]} {
    %c0_i32 = arith.constant 0 : i32
    %0 = arith.cmpi eq, %arg1, %c0_i32 : i32
    %1 = arith.extui %0 : i1 to i32
    %c0_i32_0 = arith.constant 0 : i32
    %2 = arith.cmpi ne, %1, %c0_i32_0 : i32
    scf.if %2 {
      %c0_15 = arith.constant 0 : index
      %c0_16 = arith.constant 0 : index
      %49 = vector.load %arg3[%c0_15, %c0_16] : memref<16x128xf32, #tpu.memory_space<vmem>>, vector<16x128xf32>
      %cst_17 = arith.constant dense<0.000000e+00> : vector<16xf32>
      %50 = vector.multi_reduction <add>, %49, %cst_17 [1] : vector<16x128xf32> to vector<16xf32>
      %51 = vector.shape_cast %50 : vector<16xf32> to vector<16x1xf32>
      %52 = arith.mulf %49, %49 : vector<16x128xf32>
      %cst_18 = arith.constant dense<0.000000e+00> : vector<16xf32>
      %53 = vector.multi_reduction <add>, %52, %cst_18 [1] : vector<16x128xf32> to vector<16xf32>
      %54 = vector.shape_cast %53 : vector<16xf32> to vector<16x1xf32>
      %cst_19 = arith.constant 7.812500e-03 : f32
      %55 = vector.broadcast %cst_19 : f32 to vector<16x1xf32>
      %56 = arith.mulf %51, %55 : vector<16x1xf32>
      %57 = arith.mulf %51, %56 : vector<16x1xf32>
      %58 = arith.subf %54, %57 : vector<16x1xf32>
      %cst_20 = arith.constant 0.000000e+00 : f32
      %59 = vector.broadcast %cst_20 : f32 to vector<16x1xf32>
      %60 = arith.maximumf %58, %59 : vector<16x1xf32>
      %cst_21 = arith.constant 0.00787401571 : f32
      %61 = vector.broadcast %cst_21 : f32 to vector<16x1xf32>
      %62 = arith.mulf %60, %61 : vector<16x1xf32>
      %63 = math.sqrt %62 : vector<16x1xf32>
      %cst_22 = arith.constant 9.99999997E-7 : f32
      %64 = vector.broadcast %cst_22 : f32 to vector<16x1xf32>
      %65 = arith.addf %63, %64 : vector<16x1xf32>
      %cst_23 = arith.constant 1.000000e+00 : f32
      %66 = vector.broadcast %cst_23 : f32 to vector<16x1xf32>
      %67 = arith.divf %66, %65 : vector<16x1xf32>
      %68 = vector.broadcast %56 : vector<16x1xf32> to vector<16x128xf32>
      %69 = arith.subf %49, %68 : vector<16x128xf32>
      %70 = vector.broadcast %67 : vector<16x1xf32> to vector<16x128xf32>
      %71 = arith.mulf %69, %70 : vector<16x128xf32>
      %cst_24 = arith.constant 0.000000e+00 : f32
      %72 = vector.broadcast %cst_24 : f32 to vector<16x128xf32>
      %73 = arith.addf %71, %72 : vector<16x128xf32>
      %74 = arith.truncf %73 : vector<16x128xf32> to vector<16x128xbf16>
      %c0_25 = arith.constant 0 : index
      %c0_26 = arith.constant 0 : index
      %75 = vector.load %arg7[%c0_25, %c0_26] : memref<16x128xbf16, #tpu.memory_space<vmem>>, vector<16x128xbf16>
      tpu.vector_store %arg7[%c0_25, %c0_26], %74 {strides = array<i32>} : memref<16x128xbf16, #tpu.memory_space<vmem>>, vector<16x128xbf16>,
    } else {
    }
    %c0 = arith.constant 0 : index
    %c0_1 = arith.constant 0 : index
    %3 = vector.load %arg7[%c0, %c0_1] : memref<16x128xbf16, #tpu.memory_space<vmem>>, vector<16x128xbf16>
    %c0_2 = arith.constant 0 : index
    %c0_3 = arith.constant 0 : index
    %4 = vector.load %arg4[%c0_2, %c0_3] : memref<128x128xbf16, #tpu.memory_space<vmem>>, vector<128x128xbf16>
    %cst = arith.constant dense<0.000000e+00> : vector<16x128xf32>
    %5 = tpu.matmul %3, %4, %cst {dimension_numbers = #tpu.dot_dimension_numbers<[1], [0], [0], [1], [0, 0, 1, 1], [], []>} : vector<16x128xbf16>, vector<128x128xbf16>, vector<16x128xf32> -> vector<16x128xf32>
    %c0_4 = arith.constant 0 : index
    %c0_5 = arith.constant 0 : index
    %6 = vector.load %arg5[%c0_4, %c0_5] : memref<1x128xf32, #tpu.memory_space<vmem>>, vector<1x128xf32>
    %7 = vector.broadcast %6 : vector<1x128xf32> to vector<16x128xf32>
    %8 = arith.addf %5, %7 : vector<16x128xf32>
    %9 = tpu.iota {dimensions = array<i32: 0>} : vector<16x128xi32>
    %c16_i32 = arith.constant 16 : i32
    %10 = arith.muli %arg0, %c16_i32 : i32
    %11 = vector.broadcast %10 : i32 to vector<16x128xi32>
    %12 = arith.addi %9, %11 : vector<16x128xi32>
    %13 = tpu.iota {dimensions = array<i32: 1>} : vector<16x128xi32>
    %c128_i32 = arith.constant 128 : i32
    %14 = arith.muli %arg1, %c128_i32 : i32
    %15 = vector.broadcast %14 : i32 to vector<16x128xi32>
    %16 = arith.addi %13, %15 : vector<16x128xi32>
    %c-1640531535_i32 = arith.constant -1640531535 : i32
    %17 = vector.broadcast %c-1640531535_i32 : i32 to vector<16x128xi32>
    %18 = arith.muli %12, %17 : vector<16x128xi32>
    %19 = arith.addi %18, %16 : vector<16x128xi32>
    %c0_6 = arith.constant 0 : index
    %20 = memref.load %arg2[%c0_6] : memref<1xi32, #tpu.memory_space<smem>>
    %c-2048144777_i32 = arith.constant -2048144777 : i32
    %21 = arith.muli %20, %c-2048144777_i32 : i32
    %22 = vector.broadcast %21 : i32 to vector<16x128xi32>
    %23 = arith.addi %19, %22 : vector<16x128xi32>
    %c16_i32_7 = arith.constant 16 : i32
    %24 = vector.broadcast %c16_i32_7 : i32 to vector<16x128xi32>
    %25 = arith.shrui %23, %24 : vector<16x128xi32>
    %26 = arith.xori %23, %25 : vector<16x128xi32>
    %c-2048144789_i32 = arith.constant -2048144789 : i32
    %27 = vector.broadcast %c-2048144789_i32 : i32 to vector<16x128xi32>
    %28 = arith.muli %26, %27 : vector<16x128xi32>
    %c13_i32 = arith.constant 13 : i32
    %29 = vector.broadcast %c13_i32 : i32 to vector<16x128xi32>
    %30 = arith.shrui %28, %29 : vector<16x128xi32>
    %31 = arith.xori %28, %30 : vector<16x128xi32>
    %c-1028477387_i32 = arith.constant -1028477387 : i32
    %32 = vector.broadcast %c-1028477387_i32 : i32 to vector<16x128xi32>
    %33 = arith.muli %31, %32 : vector<16x128xi32>
    %c16_i32_8 = arith.constant 16 : i32
    %34 = vector.broadcast %c16_i32_8 : i32 to vector<16x128xi32>
    %35 = arith.shrui %33, %34 : vector<16x128xi32>
    %36 = arith.xori %33, %35 : vector<16x128xi32>
    %c429496730_i32 = arith.constant 429496730 : i32
    %37 = vector.broadcast %c429496730_i32 : i32 to vector<16x128xi32>
    %38 = arith.cmpi uge, %36, %37 : vector<16x128xi32>
    %cst_9 = arith.constant 1.11111116 : f32
    %39 = vector.broadcast %cst_9 : f32 to vector<16x128xf32>
    %40 = arith.mulf %8, %39 : vector<16x128xf32>
    %cst_10 = arith.constant 0.000000e+00 : f32
    %41 = vector.broadcast %cst_10 : f32 to vector<16x128xf32>
    %42 = arith.select %38, %40, %41 : vector<16x128xi1>, vector<16x128xf32>
    %c128_i32_11 = arith.constant 128 : i32
    %43 = arith.muli %arg1, %c128_i32_11 : i32
    %44 = tpu.assume_multiple %43, 128 : i32
    %c0_12 = arith.constant 0 : index
    %45 = arith.index_cast %44 : i32 to index
    %46 = vector.load %arg3[%c0_12, %45] : memref<16x128xf32, #tpu.memory_space<vmem>>, vector<16x128xf32>
    %47 = arith.addf %46, %42 : vector<16x128xf32>
    %c0_13 = arith.constant 0 : index
    %c0_14 = arith.constant 0 : index
    %48 = vector.load %arg6[%c0_13, %c0_14] : memref<16x128xf32, #tpu.memory_space<vmem>>, vector<16x128xf32>
    tpu.vector_store %arg6[%c0_13, %c0_14], %47 {strides = array<i32>} : memref<16x128xf32, #tpu.memory_space<vmem>>, vector<16x128xf32>,
    return
  }
  func.func @transform_0(%arg0: i32, %arg1: i32, %arg2: memref<1xi32, #tpu.memory_space<smem>>) -> (i32, i32) {
    %c0_i32 = arith.constant 0 : i32
    %c0_i32_0 = arith.constant 0 : i32
    return %arg0, %c0_i32 : i32, i32
  }
  func.func @transform_1(%arg0: i32, %arg1: i32, %arg2: memref<1xi32, #tpu.memory_space<smem>>) -> (i32, i32) {
    %c0_i32 = arith.constant 0 : i32
    %c0_i32_0 = arith.constant 0 : i32
    return %c0_i32, %arg1 : i32, i32
  }
  func.func @transform_2(%arg0: i32, %arg1: i32, %arg2: memref<1xi32, #tpu.memory_space<smem>>) -> (i32, i32) {
    %c0_i32 = arith.constant 0 : i32
    %c0_i32_0 = arith.constant 0 : i32
    return %c0_i32, %arg1 : i32, i32
  }
  func.func @transform_3(%arg0: i32, %arg1: i32, %arg2: memref<1xi32, #tpu.memory_space<smem>>) -> (i32, i32) {
    %c0_i32 = arith.constant 0 : i32
    return %arg0, %arg1 : i32, i32
  }
}

</mosaic_0001>

<bundles_post_ra>
// kernel: tpu_custom_call.1
= control target key start
LH: loop header
LB: loop body
LE: loop exit
PB: predicated region body
PF: predicated region fallthrough
CT: control target
= control target key end

     0   :  { %10 = vsyncpa [#allocation6], 0  ;;  %s515_s0 = inlined_call_operand.<no memory space> [shape: s32[1], index: 0, kind: input, shape index: {}]   ;;  %s516_s1 = inlined_call_operand.hbm [shape: f32[16,128], index: 1, kind: input, shape index: {}]   ;;  %s517_s2 = inlined_call_operand.hbm [shape: bf16[128,128], index: 2, kind: input, shape index: {}]   ;;  %s518_s3 = inlined_call_operand.vmem [shape: f32[1,128], index: 3, kind: input, shape index: {}]   ;;  %s519_s4 = inlined_call_operand.hbm [shape: f32[16,128], index: 4, kind: output, shape index: {}]  }
   0x1   :  { %11 = vsyncpa [#allocation9], 0 }
   0x2   :  { %12 = vsyncpa [#allocation7], 0  ;;  %s419_s15 = smov [#allocation5]   ;;  %s347_s19 = scalar_lea.hbm %s516_s1, 256 }
   0x3   :  { %s18_s16 = sshll.u32 %s419_s15, 4  ;;  %p348_p0 = scmp.ne.s32.totalorder %s516_s1, %s347_s19  ;;  %s19_s16 = int_to_ptr.vmem [resolvable:$true] %s18_s16 }
   0x4   :  { %p351_p1 = scmp.lt.u32.totalorder %s347_s19, %s516_s1 }
   0x6   :  { %p353_p2 = pnand %p351_p1, %p348_p0 }
   0x8   :  { %356 = shalt.err (!%p353_p2)
}
   0x9   :  { %s357_s24 = scalar_lea.vmem %s19_s16, 256  ;;  %p362_p4 = scmp.lt.s32.totalorder %s19_s16, %s19_s16 }
   0xa   :  { %p358_p3 = scmp.ne.s32.totalorder %s19_s16, %s357_s24  ;;  %p363_p5 = scmp.lt.s32.totalorder %s357_s24, %s357_s24 }
   0xc   :  { %p364_p6 = por %p363_p5, %p362_p4 }
   0xe   :  { %p365_p7 = pnand %p364_p6, %p358_p3 }
  0x10   :  { %368 = shalt.err (!%p365_p7)
}
  0x11   :  { %s420_s25 = smov 128   ;;  %s421_s26 = smov 8  }
  0x12   :  { %24 = dma.hbm_to_vmem [thread:$0]  %s516_s1, 256, %s19_s16, [#allocation6], %s420_s25, %s420_s25, %s421_s26  }
  0x13   :  { %s422_s29 = smov [#allocation8]   ;;  %s369_s7 = scalar_lea.hbm %s517_s2, 1024 }
  0x14   :  { %s30_s30 = sshll.u32 %s422_s29, 4  ;;  %p370_p8 = scmp.ne.s32.totalorder %s517_s2, %s369_s7  ;;  %s31_s30 = int_to_ptr.vmem [resolvable:$true] %s30_s30 }
  0x15   :  { %p373_p9 = scmp.lt.u32.totalorder %s369_s7, %s517_s2 }
  0x17   :  { %p375_p10 = pnand %p373_p9, %p370_p8 }
  0x19   :  { %378 = shalt.err (!%p375_p10)
}
  0x1a   :  { %s379_s12 = scalar_lea.vmem %s31_s30, 1024  ;;  %p384_p12 = scmp.lt.s32.totalorder %s31_s30, %s31_s30 }
  0x1b   :  { %p380_p11 = scmp.ne.s32.totalorder %s31_s30, %s379_s12  ;;  %p385_p13 = scmp.lt.s32.totalorder %s379_s12, %s379_s12 }
  0x1d   :  { %p386_p0 = por %p385_p13, %p384_p12 }
  0x1f   :  { %p387_p1 = pnand %p386_p0, %p380_p11 }
  0x21   :  { %390 = shalt.err (!%p387_p1)
}
  0x22   :  { %s423_s1 = smov 64   ;;  %s424_s13 = smov 4  }
  0x23   :  { %36 = dma.hbm_to_vmem [thread:$0]  %s517_s2, 1024, %s31_s30, [#allocation9], %s423_s1, %s423_s1, %s424_s13  }
  0x24   :  { %413 = dma.done.wait [#allocation6], 256  }
  0x25   :  { %414 = vsyncadd [#allocation6], 4294967040 }
  0x26   :  { %415 = dma.done.wait [#allocation9], 1024  }
  0x27   :  { %416 = vsyncadd [#allocation9], 4294966272  ;;  %v480_v0 = vld [vmem:[#allocation5] sm:$0xff]  ;;  %v482_v1 = vld [vmem:[#allocation5 + $0x8] sm:$0xff]  ;;  %v425_v5 = vmov 0.0   ;;  %vm426_vm0 = vmmov 0   ;;  %v213_v46 = vlaneseq }
  0x28   :  { %52 = vadd.xlane.f32.xlu0 %v480_v0  ;;  %v56_v2 = vmul.f32 %v480_v0, %v480_v0  ;;  %v57_v3 = vmul.f32 %v482_v1, %v482_v1  ;;  %v331_v4 = vld [vmem:[#allocation8] sm:$0xff]   ;;  %302 = vmatprep.subr.bf16.mxu0 %v425_v5  ;;  %v332_v6 = vld [vmem:[#allocation8 + $0x8] sm:$0xff]   ;;  %v333_v7 = vld [vmem:[#allocation8 + $0x10] sm:$0xff]   ;;  %s230_s17 = smul.u32 2246822519, %s515_s0  ;;  %s427_s19 = smov [#allocation10]  }
  0x29   :  { %303 = vmatpush3.bf16.msra.mxu0 %v331_v4  ;;  %v334_v8 = vld [vmem:[#allocation8 + $0x18] sm:$0xff]   ;;  %v335_v9 = vld [vmem:[#allocation8 + $0x20] sm:$0xff]   ;;  %318 = vmatprep.mubr.msk.bf16.mxu0 %vm426_vm0, %v425_v5  ;;  %v336_v10 = vld [vmem:[#allocation8 + $0x28] sm:$0xff]   ;;  %v214_v47 = vshrl.u32 %v213_v46, 7  ;;  %v221_v49 = vand.u32 127, %v213_v46  ;;  %s270_s20 = sshll.u32 %s427_s19, 4  ;;  %s271_s20 = int_to_ptr.vmem [resolvable:$true] %s270_s20 }
  0x2a   :  { %58 = vadd.xlane.f32.xlu1 %v56_v2  ;;  %304 = vmatprep.subr.bf16.mxu0 %v425_v5  ;;  %v337_v11 = vld [vmem:[#allocation8 + $0x30] sm:$0xff]   ;;  %v338_v12 = vld [vmem:[#allocation8 + $0x38] sm:$0xff]   ;;  %v231_v53 = vstv %s230_s17  ;;  %p396_p3 = scmp.lt.s32.totalorder %s271_s20, %s271_s20 }
  0x2b   :  { %v215_v48 = vadd.s32 8, %v214_v47  ;;  %v225_v50 = vmul.u32 2654435761, %v214_v47 }
  0x2c   :  { %54 = vadd.xlane.f32.xlu0 %v482_v1 }
  0x2d   :  { %305 = vmatpush3.bf16.msra.mxu0 %v332_v6  ;;  %v226_v51 = vmul.u32 2654435761, %v215_v48  ;;  %v227_v52 = vadd.s32 %v225_v50, %v221_v49 }
  0x2e   :  { %60 = vadd.xlane.f32.xlu1 %v57_v3  ;;  %306 = vmatprep.subr.bf16.mxu0 %v425_v5 }
  0x2f   :  { %v228_v54 = vadd.s32 %v226_v51, %v221_v49  ;;  %v232_v55 = vadd.s32 %v231_v53, %v227_v52 }
  0x31   :  { %307 = vmatpush3.bf16.msra.mxu0 %v333_v7  ;;  %v233_v56 = vadd.s32 %v231_v53, %v228_v54  ;;  %v234_v57 = vshrl.u32 %v232_v55, 16 }
  0x32   :  { %308 = vmatprep.subr.bf16.mxu0 %v425_v5 }
  0x33   :  { %v235_v58 = vshrl.u32 %v233_v56, 16  ;;  %v236_v59 = vxor.u32 %v234_v57, %v232_v55 }
  0x35   :  { %309 = vmatpush3.bf16.msra.mxu0 %v334_v8  ;;  %v237_v60 = vxor.u32 %v235_v58, %v233_v56  ;;  %v238_v61 = vmul.u32 2246822507, %v236_v59 }
  0x36   :  { %310 = vmatprep.subr.bf16.mxu0 %v425_v5 }
  0x37   :  { %v239_v62 = vmul.u32 2246822507, %v237_v60  ;;  %v240_v63 = vshrl.u32 %v238_v61, 13 }
  0x39   :  { %311 = vmatpush3.bf16.msra.mxu0 %v335_v9  ;;  %v241_v2 = vshrl.u32 %v239_v62, 13  ;;  %v242_v3 = vxor.u32 %v240_v63, %v238_v61  ;;  %v284_v9 = vld [vmem:[%s518_s3] ss:$0 sm:$0xff]  ;;  %s391_s3 = scalar_lea.vmem %s271_s20, 256 }
  0x3a   :  { %312 = vmatprep.subr.bf16.mxu0 %v425_v5  ;;  %p392_p2 = scmp.ne.s32.totalorder %s271_s20, %s391_s3  ;;  %p397_p4 = scmp.lt.s32.totalorder %s391_s3, %s391_s3 }
  0x3b   :  { %v243_v4 = vxor.u32 %v241_v2, %v239_v62 }
  0x3c   :  { %p398_p5 = por %p397_p4, %p396_p3 }
  0x3d   :  { %313 = vmatpush3.bf16.msra.mxu0 %v336_v10  ;;  %v245_v6 = vmul.u32 3266489909, %v243_v4 }
  0x3e   :  { %314 = vmatprep.subr.bf16.mxu0 %v425_v5  ;;  %p399_p6 = pnand %p398_p5, %p392_p2 }
  0x3f   :  { %v247_v8 = vshrl.u32 %v245_v6, 16 }
  0x41   :  { %315 = vmatpush3.bf16.msra.mxu0 %v337_v11 }
  0x42   :  { %316 = vmatprep.subr.bf16.mxu0 %v425_v5  ;;  %v244_v5 = vmul.u32 3266489909, %v242_v3 }
  0x44   :  { %v246_v7 = vshrl.u32 %v244_v5, 16 }
  0x45   :  { %317 = vmatpush3.bf16.msra.mxu0 %v338_v12  ;;  %v249_v12 = vxor.u32 %v247_v8, %v245_v6 }
  0x46   :  { %v248_v10 = vxor.u32 %v246_v7, %v244_v5 }
  0x47   :  { %vm251_vm6 = vcmp.ge.u32.totalorder %v249_v12, 429496730 }
  0x48   :  { %vm250_vm5 = vcmp.ge.u32.totalorder %v248_v10, 429496730 }
  0xb5   :  { %v53_v13 = vpop.xlane.xlu0 %52 }
  0xb6   :  { %v62_v14 = vmul.f32 0.0078125, %v53_v13 }
  0xb7   :  { %v59_v15 = vpop.xlane.xlu1 %58 }
  0xb8   :  { %v64_v16 = vmul.f32 %v62_v14, %v53_v13  ;;  %v92_v40 = vsub.f32 %v480_v0, %v62_v14 }
  0xb9   :  { %v55_v17 = vpop.xlane.xlu0 %54 }
  0xba   :  { %v63_v18 = vmul.f32 0.0078125, %v55_v17  ;;  %v66_v19 = vsub.f32 %v59_v15, %v64_v16 }
  0xbb   :  { %v61_v20 = vpop.xlane.xlu1 %60 }
  0xbc   :  { %v65_v21 = vmul.f32 %v63_v18, %v55_v17  ;;  %v68_v22 = vmax.f32 %v66_v19, 0.0  ;;  %v93_v41 = vsub.f32 %v482_v1, %v63_v18 }
  0xbe   :  { %v70_v23 = vmul.f32 0.007874016, %v68_v22  ;;  %v67_v24 = vsub.f32 %v61_v20, %v65_v21 }
  0xc0   :  { %339 = vrsqrt.f32 %v70_v23  ;;  %v69_v25 = vmax.f32 %v67_v24, 0.0  ;;  %vm74_vm1 = vcmp.eq.f32.partialorder %v70_v23, inf  ;;  %v77_v29 = vand.u32 2147483648, %v70_v23 }
  0xc1   :  { %vm76_vm2 = vcmp.eq.f32.partialorder %v70_v23, 0.0 }
  0xc2   :  { %v71_v26 = vmul.f32 0.007874016, %v69_v25 }
  0xc4   :  { %341 = vrsqrt.f32 %v71_v26  ;;  %vm81_vm3 = vcmp.eq.f32.partialorder %v71_v26, inf  ;;  %v84_v35 = vand.u32 2147483648, %v71_v26  ;;  %vm83_vm4 = vcmp.eq.f32.partialorder %v71_v26, 0.0 }
  0xca   :  { %v340_v27 = vpop.eup %339 }
  0xcb   :  { %v73_v28 = vmul.f32 %v340_v27, %v70_v23 }
  0xcd   :  { %v75_v30 = vsel %vm74_vm1, %v70_v23, %v73_v28 }
  0xce   :  { %v78_v31 = vsel %vm76_vm2, %v77_v29, %v75_v30  ;;  %v342_v32 = vpop.eup %341 }
  0xcf   :  { %v80_v33 = vmul.f32 %v342_v32, %v71_v26  ;;  %v86_v34 = vadd.f32 1e-06, %v78_v31 }
  0xd1   :  { %v82_v36 = vsel %vm81_vm3, %v71_v26, %v80_v33  ;;  %343 = vrcp.f32 %v86_v34 }
  0xd2   :  { %v85_v37 = vsel %vm83_vm4, %v84_v35, %v82_v36 }
  0xd3   :  { %v87_v38 = vadd.f32 1e-06, %v85_v37 }
  0xd5   :  { %345 = vrcp.f32 %v87_v38 }
  0xdb   :  { %v344_v39 = vpop.eup %343 }
  0xdc   :  { %v94_v43 = vmul.f32 %v344_v39, %v92_v40 }
  0xdf   :  { %v346_v42 = vpop.eup %345 }
  0xe0   :  { %v95_v44 = vmul.f32 %v346_v42, %v93_v41 }
  0xe2   :  { %v98_v45 = vpack.c.bf16 %v95_v44, %v94_v43 }
  0xe4   :  { %319 = vmatmul.mubr.bf16.vlgmr.msra.gmra.mrb[0].mxu0 %v98_v45 }
 0x1b7   :  { %v206_v11 = vpop.f32.mrb[0].mxu0 }
 0x1b8   :  { %v207_v13 = vadd.f32 %v284_v9, %v206_v11  ;;  %v320_v14 = vpop.f32.mrb[1].mxu0 }
 0x1b9   :  { %v209_v15 = vpop.f32.mrb[2].mxu0 }
 0x1ba   :  { %v252_v16 = vmul.f32 1.1111112, %v207_v13  ;;  %v210_v17 = vadd.f32 %v284_v9, %v209_v15  ;;  %v321_v18 = vpop.f32.mrb[3].mxu0 }
 0x1bc   :  { %v254_v19 = vsel %vm250_vm5, %v252_v16, 0.0  ;;  %v253_v20 = vmul.f32 1.1111112, %v210_v17 }
 0x1bd   :  { %v261_v21 = vadd.f32 %v254_v19, %v480_v0 }
 0x1be   :  { %v255_v22 = vsel %vm251_vm6, %v253_v20, 0.0 }
 0x1bf   :  { %263 = vst [vmem:[#allocation10] sm:$0xff] %v261_v21  ;;  %v262_v23 = vadd.f32 %v255_v22, %v482_v1 }
 0x1c1   :  { %264 = vst [vmem:[#allocation10 + $0x8] sm:$0xff] %v262_v23 }
 0x1c2   :  { %402 = shalt.err (!%p399_p6)
}
 0x1c3   :  { %s403_s23 = scalar_lea.hbm %s519_s4, 256 }
 0x1c4   :  { %p404_p7 = scmp.ne.s32.totalorder %s519_s4, %s403_s23  ;;  %p407_p8 = scmp.lt.u32.totalorder %s403_s23, %s519_s4 }
 0x1c6   :  { %p409_p9 = pnand %p407_p8, %p404_p7 }
 0x1c8   :  { %412 = shalt.err (!%p409_p9)
}
 0x1c9   :  { %276 = dma.vmem_to_hbm [thread:$0]  %s271_s20, 256, %s519_s4, [#allocation7], %s420_s25, %s420_s25, %s421_s26  }
 0x1ca   :  { %417 = dma.done.wait [#allocation7], 256  }
 0x1cb   :  { %418 = vsyncadd [#allocation7], 4294967040 }
 0x1cc   :  { %280 = vsyncpa [#allocation6], 1 }
 0x1cd   :  { %281 = vsyncpa [#allocation9], 1 }
 0x1ce   :  { %282 = vsyncpa [#allocation7], 1 }

// kernel: tpu_custom_call.1
= control target key start
LH: loop header
LB: loop body
LE: loop exit
PB: predicated region body
PF: predicated region fallthrough
CT: control target
= control target key end

     0   :  { %10 = vsyncpa [#allocation6], 0  ;;  %s515_s0 = inlined_call_operand.<no memory space> [shape: s32[1], index: 0, kind: input, shape index: {}]   ;;  %s516_s1 = inlined_call_operand.hbm [shape: f32[16,128], index: 1, kind: input, shape index: {}]   ;;  %s517_s2 = inlined_call_operand.hbm [shape: bf16[128,128], index: 2, kind: input, shape index: {}]   ;;  %s518_s3 = inlined_call_operand.vmem [shape: f32[1,128], index: 3, kind: input, shape index: {}]   ;;  %s519_s4 = inlined_call_operand.hbm [shape: f32[16,128], index: 4, kind: output, shape index: {}]  }
   0x1   :  { %11 = vsyncpa [#allocation9], 0 }
   0x2   :  { %12 = vsyncpa [#allocation7], 0  ;;  %s419_s15 = smov [#allocation5]   ;;  %s347_s19 = scalar_lea.hbm %s516_s1, 256 }
   0x3   :  { %s18_s16 = sshll.u32 %s419_s15, 4  ;;  %p348_p0 = scmp.ne.s32.totalorder %s516_s1, %s347_s19  ;;  %s19_s16 = int_to_ptr.vmem [resolvable:$true] %s18_s16 }
   0x4   :  { %p351_p1 = scmp.lt.u32.totalorder %s347_s19, %s516_s1 }
   0x6   :  { %p353_p2 = pnand %p351_p1, %p348_p0 }
   0x8   :  { %356 = shalt.err (!%p353_p2)
}
   0x9   :  { %s357_s24 = scalar_lea.vmem %s19_s16, 256  ;;  %p362_p4 = scmp.lt.s32.totalorder %s19_s16, %s19_s16 }
   0xa   :  { %p358_p3 = scmp.ne.s32.totalorder %s19_s16, %s357_s24  ;;  %p363_p5 = scmp.lt.s32.totalorder %s357_s24, %s357_s24 }
   0xc   :  { %p364_p6 = por %p363_p5, %p362_p4 }
   0xe   :  { %p365_p7 = pnand %p364_p6, %p358_p3 }
  0x10   :  { %368 = shalt.err (!%p365_p7)
}
  0x11   :  { %s420_s25 = smov 128   ;;  %s421_s26 = smov 8  }
  0x12   :  { %24 = dma.hbm_to_vmem [thread:$0]  %s516_s1, 256, %s19_s16, [#allocation6], %s420_s25, %s420_s25, %s421_s26  }
  0x13   :  { %s422_s29 = smov [#allocation8]   ;;  %s369_s7 = scalar_lea.hbm %s517_s2, 1024 }
  0x14   :  { %s30_s30 = sshll.u32 %s422_s29, 4  ;;  %p370_p8 = scmp.ne.s32.totalorder %s517_s2, %s369_s7  ;;  %s31_s30 = int_to_ptr.vmem [resolvable:$true] %s30_s30 }
  0x15   :  { %p373_p9 = scmp.lt.u32.totalorder %s369_s7, %s517_s2 }
  0x17   :  { %p375_p10 = pnand %p373_p9, %p370_p8 }
  0x19   :  { %378 = shalt.err (!%p375_p10)
}
  0x1a   :  { %s379_s12 = scalar_lea.vmem %s31_s30, 1024  ;;  %p384_p12 = scmp.lt.s32.totalorder %s31_s30, %s31_s30 }
  0x1b   :  { %p380_p11 = scmp.ne.s32.totalorder %s31_s30, %s379_s12  ;;  %p385_p13 = scmp.lt.s32.totalorder %s379_s12, %s379_s12 }
  0x1d   :  { %p386_p0 = por %p385_p13, %p384_p12 }
  0x1f   :  { %p387_p1 = pnand %p386_p0, %p380_p11 }
  0x21   :  { %390 = shalt.err (!%p387_p1)
}
  0x22   :  { %s423_s1 = smov 64   ;;  %s424_s13 = smov 4  }
  0x23   :  { %36 = dma.hbm_to_vmem [thread:$0]  %s517_s2, 1024, %s31_s30, [#allocation9], %s423_s1, %s423_s1, %s424_s13  }
  0x24   :  { %413 = dma.done.wait [#allocation6], 256  }
  0x25   :  { %414 = vsyncadd [#allocation6], 4294967040 }
  0x26   :  { %415 = dma.done.wait [#allocation9], 1024  }
  0x27   :  { %416 = vsyncadd [#allocation9], 4294966272  ;;  %v480_v0 = vld [vmem:[#allocation5] sm:$0xff]  ;;  %v482_v1 = vld [vmem:[#allocation5 + $0x8] sm:$0xff]  ;;  %v425_v5 = vmov 0.0   ;;  %vm426_vm0 = vmmov 0   ;;  %v213_v46 = vlaneseq }
  0x28   :  { %52 = vadd.xlane.f32.xlu0 %v480_v0  ;;  %v56_v2 = vmul.f32 %v480_v0, %v480_v0  ;;  %v57_v3 = vmul.f32 %v482_v1, %v482_v1  ;;  %v331_v4 = vld [vmem:[#allocation8] sm:$0xff]   ;;  %302 = vmatprep.subr.bf16.mxu0 %v425_v5  ;;  %v332_v6 = vld [vmem:[#allocation8 + $0x8] sm:$0xff]   ;;  %v333_v7 = vld [vmem:[#allocation8 + $0x10] sm:$0xff]   ;;  %s230_s17 = smul.u32 2246822519, %s515_s0  ;;  %s427_s19 = smov [#allocation10]  }
  0x29   :  { %303 = vmatpush3.bf16.msra.mxu0 %v331_v4  ;;  %v334_v8 = vld [vmem:[#allocation8 + $0x18] sm:$0xff]   ;;  %v335_v9 = vld [vmem:[#allocation8 + $0x20] sm:$0xff]   ;;  %318 = vmatprep.mubr.msk.bf16.mxu0 %vm426_vm0, %v425_v5  ;;  %v336_v10 = vld [vmem:[#allocation8 + $0x28] sm:$0xff]   ;;  %v214_v47 = vshrl.u32 %v213_v46, 7  ;;  %v221_v49 = vand.u32 127, %v213_v46  ;;  %s270_s20 = sshll.u32 %s427_s19, 4  ;;  %s271_s20 = int_to_ptr.vmem [resolvable:$true] %s270_s20 }
  0x2a   :  { %58 = vadd.xlane.f32.xlu1 %v56_v2  ;;  %304 = vmatprep.subr.bf16.mxu0 %v425_v5  ;;  %v337_v11 = vld [vmem:[#allocation8 + $0x30] sm:$0xff]   ;;  %v338_v12 = vld [vmem:[#allocation8 + $0x38] sm:$0xff]   ;;  %v231_v53 = vstv %s230_s17  ;;  %p396_p3 = scmp.lt.s32.totalorder %s271_s20, %s271_s20 }
  0x2b   :  { %v215_v48 = vadd.s32 8, %v214_v47  ;;  %v225_v50 = vmul.u32 2654435761, %v214_v47 }
  0x2c   :  { %54 = vadd.xlane.f32.xlu0 %v482_v1 }
  0x2d   :  { %305 = vmatpush3.bf16.msra.mxu0 %v332_v6  ;;  %v226_v51 = vmul.u32 2654435761, %v215_v48  ;;  %v227_v52 = vadd.s32 %v225_v50, %v221_v49 }
  0x2e   :  { %60 = vadd.xlane.f32.xlu1 %v57_v3  ;;  %306 = vmatprep.subr.bf16.mxu0 %v425_v5 }
  0x2f   :  { %v228_v54 = vadd.s32 %v226_v51, %v221_v49  ;;  %v232_v55 = vadd.s32 %v231_v53, %v227_v52 }
  0x31   :  { %307 = vmatpush3.bf16.msra.mxu0 %v333_v7  ;;  %v233_v56 = vadd.s32 %v231_v53, %v228_v54  ;;  %v234_v57 = vshrl.u32 %v232_v55, 16 }
  0x32   :  { %308 = vmatprep.subr.bf16.mxu0 %v425_v5 }
  0x33   :  { %v235_v58 = vshrl.u32 %v233_v56, 16  ;;  %v236_v59 = vxor.u32 %v234_v57, %v232_v55 }
  0x35   :  { %309 = vmatpush3.bf16.msra.mxu0 %v334_v8  ;;  %v237_v60 = vxor.u32 %v235_v58, %v233_v56  ;;  %v238_v61 = vmul.u32 2246822507, %v236_v59 }
  0x36   :  { %310 = vmatprep.subr.bf16.mxu0 %v425_v5 }
  0x37   :  { %v239_v62 = vmul.u32 2246822507, %v237_v60  ;;  %v240_v63 = vshrl.u32 %v238_v61, 13 }
  0x39   :  { %311 = vmatpush3.bf16.msra.mxu0 %v335_v9  ;;  %v241_v2 = vshrl.u32 %v239_v62, 13  ;;  %v242_v3 = vxor.u32 %v240_v63, %v238_v61  ;;  %v284_v9 = vld [vmem:[%s518_s3] ss:$0 sm:$0xff]  ;;  %s391_s3 = scalar_lea.vmem %s271_s20, 256 }
  0x3a   :  { %312 = vmatprep.subr.bf16.mxu0 %v425_v5  ;;  %p392_p2 = scmp.ne.s32.totalorder %s271_s20, %s391_s3  ;;  %p397_p4 = scmp.lt.s32.totalorder %s391_s3, %s391_s3 }
  0x3b   :  { %v243_v4 = vxor.u32 %v241_v2, %v239_v62 }
  0x3c   :  { %p398_p5 = por %p397_p4, %p396_p3 }
  0x3d   :  { %313 = vmatpush3.bf16.msra.mxu0 %v336_v10  ;;  %v245_v6 = vmul.u32 3266489909, %v243_v4 }
  0x3e   :  { %314 = vmatprep.subr.bf16.mxu0 %v425_v5  ;;  %p399_p6 = pnand %p398_p5, %p392_p2 }
  0x3f   :  { %v247_v8 = vshrl.u32 %v245_v6, 16 }
  0x41   :  { %315 = vmatpush3.bf16.msra.mxu0 %v337_v11 }
  0x42   :  { %316 = vmatprep.subr.bf16.mxu0 %v425_v5  ;;  %v244_v5 = vmul.u32 3266489909, %v242_v3 }
  0x44   :  { %v246_v7 = vshrl.u32 %v244_v5, 16 }
  0x45   :  { %317 = vmatpush3.bf16.msra.mxu0 %v338_v12  ;;  %v249_v12 = vxor.u32 %v247_v8, %v245_v6 }
  0x46   :  { %v248_v10 = vxor.u32 %v246_v7, %v244_v5 }
  0x47   :  { %vm251_vm6 = vcmp.ge.u32.totalorder %v249_v12, 429496730 }
  0x48   :  { %vm250_vm5 = vcmp.ge.u32.totalorder %v248_v10, 429496730 }
  0xb5   :  { %v53_v13 = vpop.xlane.xlu0 %52 }
  0xb6   :  { %v62_v14 = vmul.f32 0.0078125, %v53_v13 }
  0xb7   :  { %v59_v15 = vpop.xlane.xlu1 %58 }
  0xb8   :  { %v64_v16 = vmul.f32 %v62_v14, %v53_v13  ;;  %v92_v40 = vsub.f32 %v480_v0, %v62_v14 }
  0xb9   :  { %v55_v17 = vpop.xlane.xlu0 %54 }
  0xba   :  { %v63_v18 = vmul.f32 0.0078125, %v55_v17  ;;  %v66_v19 = vsub.f32 %v59_v15, %v64_v16 }
  0xbb   :  { %v61_v20 = vpop.xlane.xlu1 %60 }
  0xbc   :  { %v65_v21 = vmul.f32 %v63_v18, %v55_v17  ;;  %v68_v22 = vmax.f32 %v66_v19, 0.0  ;;  %v93_v41 = vsub.f32 %v482_v1, %v63_v18 }
  0xbe   :  { %v70_v23 = vmul.f32 0.007874016, %v68_v22  ;;  %v67_v24 = vsub.f32 %v61_v20, %v65_v21 }
  0xc0   :  { %339 = vrsqrt.f32 %v70_v23  ;;  %v69_v25 = vmax.f32 %v67_v24, 0.0  ;;  %vm74_vm1 = vcmp.eq.f32.partialorder %v70_v23, inf  ;;  %v77_v29 = vand.u32 2147483648, %v70_v23 }
  0xc1   :  { %vm76_vm2 = vcmp.eq.f32.partialorder %v70_v23, 0.0 }
  0xc2   :  { %v71_v26 = vmul.f32 0.007874016, %v69_v25 }
  0xc4   :  { %341 = vrsqrt.f32 %v71_v26  ;;  %vm81_vm3 = vcmp.eq.f32.partialorder %v71_v26, inf  ;;  %v84_v35 = vand.u32 2147483648, %v71_v26  ;;  %vm83_vm4 = vcmp.eq.f32.partialorder %v71_v26, 0.0 }
  0xca   :  { %v340_v27 = vpop.eup %339 }
  0xcb   :  { %v73_v28 = vmul.f32 %v340_v27, %v70_v23 }
  0xcd   :  { %v75_v30 = vsel %vm74_vm1, %v70_v23, %v73_v28 }
  0xce   :  { %v78_v31 = vsel %vm76_vm2, %v77_v29, %v75_v30  ;;  %v342_v32 = vpop.eup %341 }
  0xcf   :  { %v80_v33 = vmul.f32 %v342_v32, %v71_v26  ;;  %v86_v34 = vadd.f32 1e-06, %v78_v31 }
  0xd1   :  { %v82_v36 = vsel %vm81_vm3, %v71_v26, %v80_v33  ;;  %343 = vrcp.f32 %v86_v34 }
  0xd2   :  { %v85_v37 = vsel %vm83_vm4, %v84_v35, %v82_v36 }
  0xd3   :  { %v87_v38 = vadd.f32 1e-06, %v85_v37 }
  0xd5   :  { %345 = vrcp.f32 %v87_v38 }
  0xdb   :  { %v344_v39 = vpop.eup %343 }
  0xdc   :  { %v94_v43 = vmul.f32 %v344_v39, %v92_v40 }
  0xdf   :  { %v346_v42 = vpop.eup %345 }
  0xe0   :  { %v95_v44 = vmul.f32 %v346_v42, %v93_v41 }
  0xe2   :  { %v98_v45 = vpack.c.bf16 %v95_v44, %v94_v43 }
  0xe4   :  { %319 = vmatmul.mubr.bf16.vlgmr.msra.gmra.mrb[0].mxu0 %v98_v45 }
 0x1b7   :  { %v206_v11 = vpop.f32.mrb[0].mxu0 }
 0x1b8   :  { %v207_v13 = vadd.f32 %v284_v9, %v206_v11  ;;  %v320_v14 = vpop.f32.mrb[1].mxu0 }
 0x1b9   :  { %v209_v15 = vpop.f32.mrb[2].mxu0 }
 0x1ba   :  { %v252_v16 = vmul.f32 1.1111112, %v207_v13  ;;  %v210_v17 = vadd.f32 %v284_v9, %v209_v15  ;;  %v321_v18 = vpop.f32.mrb[3].mxu0 }
 0x1bc   :  { %v254_v19 = vsel %vm250_vm5, %v252_v16, 0.0  ;;  %v253_v20 = vmul.f32 1.1111112, %v210_v17 }
 0x1bd   :  { %v261_v21 = vadd.f32 %v254_v19, %v480_v0 }
 0x1be   :  { %v255_v22 = vsel %vm251_vm6, %v253_v20, 0.0 }
 0x1bf   :  { %263 = vst [vmem:[#allocation10] sm:$0xff] %v261_v21  ;;  %v262_v23 = vadd.f32 %v255_v22, %v482_v1 }
 0x1c1   :  { %264 = vst [vmem:[#allocation10 + $0x8] sm:$0xff] %v262_v23 }
 0x1c2   :  { %402 = shalt.err (!%p399_p6)
}
 0x1c3   :  { %s403_s23 = scalar_lea.hbm %s519_s4, 256 }
 0x1c4   :  { %p404_p7 = scmp.ne.s32.totalorder %s519_s4, %s403_s23  ;;  %p407_p8 = scmp.lt.u32.totalorder %s403_s23, %s519_s4 }
 0x1c6   :  { %p409_p9 = pnand %p407_p8, %p404_p7 }
 0x1c8   :  { %412 = shalt.err (!%p409_p9)
}
 0x1c9   :  { %276 = dma.vmem_to_hbm [thread:$0]  %s271_s20, 256, %s519_s4, [#allocation7], %s420_s25, %s420_s25, %s421_s26  }
 0x1ca   :  { %417 = dma.done.wait [#allocation7], 256  }
 0x1cb   :  { %418 = vsyncadd [#allocation7], 4294967040 }
 0x1cc   :  { %280 = vsyncpa [#allocation6], 1 }
 0x1cd   :  { %281 = vsyncpa [#allocation9], 1 }
 0x1ce   :  { %282 = vsyncpa [#allocation7], 1 }

</bundles_post_ra>
